<compile_context>
chip_gen: v6e
topology: v6e:2x2x1
jax: 0.10.0
libtpu: 0.0.40
codegen_flags: <defaults>
</compile_context>

<pallas_src>
import math

import jax
import jax.numpy as jnp
from jax.experimental import pallas as pl
from jax.experimental.pallas import tpu as pltpu

# ----- module hyper-parameters (match nn.Module __init__ defaults) ---------
WEIGHT_REGULARIZER = 1e-6
DROPOUT_REGULARIZER = 1e-5
INIT_MIN = 0.1
INIT_MAX = 0.1           # init_min == init_max -> p_logit is deterministic
TEMPERATURE = 0.1

# Wrapped layer: nn.Linear(in_features, out_features, bias=True)
IN_FEATURES = 128
OUT_FEATURES = 128

# TODO(synk): _get_noise_shape is abstract in the base class; the Linear
#             subclass convention (noise shape == x.shape, elementwise) is
#             implemented here. Conv-style channel-shared noise shapes are not.
# TODO(synk): the uniform noise (torch.rand) is generated outside the kernel
#             with jax.random so the result is exactly checkable; an in-kernel
#             pltpu.prng_random_bits path would remove that one HBM pass.


def _concrete_dropout_math(x, unif, p_logit, temperature):
    """Exact transcription of ConcreteDropout._concrete_dropout (f32).

    Shared by the Pallas kernel body and the pure-JAX reference so the only
    difference between the two paths is the matmul. Only exp/log/add/mul/div
    + (1,1)->tile broadcasting are used, all of which lower cleanly in Mosaic.
    """
    eps = jnp.float32(jnp.finfo(jnp.float32).eps)
    p = 1.0 / (1.0 + jnp.exp(-p_logit))                          # sigmoid, (1,1)
    drop_logit = (jnp.log(p + eps) - jnp.log(1.0 + (eps - p))
                  + jnp.log(unif + eps) - jnp.log(1.0 + (eps - unif)))
    drop_prob = 1.0 / (1.0 + jnp.exp(-(drop_logit / temperature)))
    random_tensor = 1.0 - drop_prob
    retain_prob = 1.0 - p
    # NOTE: the module adds the retain mask (x + random_tensor), per the spec.
    return (x + random_tensor) / retain_prob


# ----------------- fused Pallas kernel: dropout + Linear --------------------
def _make_concrete_dropout_linear_kernel(temperature):
    def kernel(x_ref, u_ref, w_ref, b_ref, plogit_ref, o_ref):
        xd = _concrete_dropout_math(x_ref[...], u_ref[...], plogit_ref[...],
                                    temperature)
        o_ref[...] = (jnp.dot(xd, w_ref[...],
                              preferred_element_type=jnp.float32)
                      + b_ref[...]).astype(o_ref.dtype)
    return kernel


def concrete_dropout_linear_forward(x, unif_noise, weight, bias, p_logit, *,
                                    weight_regularizer=WEIGHT_REGULARIZER,
                                    dropout_regularizer=DROPOUT_REGULARIZER,
                                    temperature=TEMPERATURE,
                                    block_m=128):
    """ConcreteDropout(nn.Linear) forward.

    x:          [B, Fin]    f32
    unif_noise: [B, Fin]    uniform(0,1) noise (replaces torch.rand)
    weight:     [Fout, Fin] (PyTorch nn.Linear layout)
    bias:       [Fout]
    p_logit:    [1, 1]
    Returns (out [B, Fout], regularization scalar).
    """
    B, Fin = x.shape
    Fout = weight.shape[0]
    block_m = min(block_m, B)
    assert B % block_m == 0 and block_m % 8 == 0, (B, block_m)

    # Lane-dense layout: weight transposed to [Fin, Fout] so the kernel output
    # block is [block_m, Fout] with Fout on the 128-lane axis (unmasked vst);
    # the weight stays resident in VMEM across all grid steps.
    w_t = jnp.transpose(weight)                 # [Fin, Fout]
    b2 = bias.reshape(1, Fout)

    out = pl.pallas_call(
        _make_concrete_dropout_linear_kernel(temperature),
        out_shape=jax.ShapeDtypeStruct((B, Fout), jnp.float32),
        grid=(B // block_m,),
        in_specs=[
            pl.BlockSpec((block_m, Fin), lambda i: (i, 0)),   # x row-block
            pl.BlockSpec((block_m, Fin), lambda i: (i, 0)),   # noise row-block
            pl.BlockSpec((Fin, Fout), lambda i: (0, 0)),      # weight (resident)
            pl.BlockSpec((1, Fout), lambda i: (0, 0)),        # bias
            pl.BlockSpec((1, 1), lambda i: (0, 0)),           # p_logit
        ],
        out_specs=pl.BlockSpec((block_m, Fout), lambda i: (i, 0)),
        compiler_params=pltpu.CompilerParams(
            dimension_semantics=("parallel",)),               # 2 steps -> both v7x TCs
    )(x, unif_noise, w_t, b2, p_logit)

    # ---- regularization side value (scalar; plain JAX, XLA fuses it) ------
    p = 1.0 / (1.0 + jnp.exp(-p_logit[0, 0]))
    kernel_reg = weight_regularizer * jnp.sum(jnp.square(weight)) / (1.0 - p)
    drop_reg = (p * jnp.log(p) + (1.0 - p) * jnp.log1p(-p)) \
               * (dropout_regularizer * Fin)
    regularization = jnp.sum(kernel_reg + drop_reg)
    return out, regularization


if __name__ == "__main__":
    key = jax.random.PRNGKey(0)
    kx, kw, kb, ku = jax.random.split(key, 4)

    B = 256
    x = jax.random.normal(kx, (B, IN_FEATURES), jnp.float32)

    # nn.Linear default init bounds
    lim = 1.0 / math.sqrt(IN_FEATURES)
    weight = jax.random.uniform(kw, (OUT_FEATURES, IN_FEATURES),
                                jnp.float32, -lim, lim)
    bias = jax.random.uniform(kb, (OUT_FEATURES,), jnp.float32, -lim, lim)

    # p_logit ~ uniform(logit(init_min), logit(init_max)); init_min == init_max
    # so it is deterministically logit(0.1).
    p_logit = jnp.full((1, 1),
                       math.log(INIT_MIN) - math.log(1.0 - INIT_MIN),
                       jnp.float32)

    # deterministic uniform noise (replaces torch.rand in _concrete_dropout)
    unif = jax.random.uniform(ku, (B, IN_FEATURES), jnp.float32)

    out, reg = concrete_dropout_linear_forward(x, unif, weight, bias, p_logit)
    out = jax.block_until_ready(out)
    assert out.shape == (B, OUT_FEATURES)

    # ---- pure-JAX reference (identical dropout math; XLA matmul) ----------
    xd = _concrete_dropout_math(x, unif, p_logit, TEMPERATURE)
    ref = jnp.dot(xd, weight.T,
                  precision=jax.lax.Precision.HIGHEST) + bias[None, :]
    max_err = float(jnp.max(jnp.abs(out - ref)))
    assert jnp.allclose(out, ref, rtol=2e-3, atol=2e-3), max_err

    p_ref = 1.0 / (1.0 + jnp.exp(-p_logit[0, 0]))
    reg_ref = (WEIGHT_REGULARIZER * jnp.sum(jnp.square(weight)) / (1.0 - p_ref)
               + (p_ref * jnp.log(p_ref)
                  + (1.0 - p_ref) * jnp.log1p(-p_ref))
               * DROPOUT_REGULARIZER * IN_FEATURES)
    assert jnp.allclose(reg, reg_ref, rtol=1e-5, atol=1e-8)

    print("KERNEL_OK")
</pallas_src>

<mosaic_0001>
module attributes {stable_mosaic.version = 11 : i64} {
  func.func @kernel(%arg0: i32, %arg1: memref<128x128xf32, #tpu.memory_space<vmem>>, %arg2: memref<128x128xf32, #tpu.memory_space<vmem>>, %arg3: memref<128x128xf32, #tpu.memory_space<vmem>>, %arg4: memref<1x128xf32, #tpu.memory_space<vmem>>, %arg5: memref<1x1xf32, #tpu.memory_space<vmem>>, %arg6: memref<128x128xf32, #tpu.memory_space<vmem>>) attributes {dimension_semantics = [#tpu.dimension_semantics<parallel>], iteration_bounds = array<i64: 2>, scalar_prefetch = 0 : i64, scratch_operands = 0 : i64, tpu.core_type = #tpu.core_type<tc>, window_params = [{transform_indices = @transform_0, window_bounds = array<i64: 128, 128>}, {transform_indices = @transform_1, window_bounds = array<i64: 128, 128>}, {pipeline_mode = #tpu.pipeline_mode<synchronous>, transform_indices = @transform_2, window_bounds = array<i64: 128, 128>}, {pipeline_mode = #tpu.pipeline_mode<synchronous>, transform_indices = @transform_3, window_bounds = array<i64: 1, 128>}, {pipeline_mode = #tpu.pipeline_mode<synchronous>, transform_indices = @transform_4, window_bounds = array<i64: 1, 1>}, {transform_indices = @transform_5, window_bounds = array<i64: 128, 128>}]} {
    %c0 = arith.constant 0 : index
    %c0_0 = arith.constant 0 : index
    %0 = vector.load %arg1[%c0, %c0_0] : memref<128x128xf32, #tpu.memory_space<vmem>>, vector<128x128xf32>
    %c0_1 = arith.constant 0 : index
    %c0_2 = arith.constant 0 : index
    %1 = vector.load %arg2[%c0_1, %c0_2] : memref<128x128xf32, #tpu.memory_space<vmem>>, vector<128x128xf32>
    %c0_3 = arith.constant 0 : index
    %c0_4 = arith.constant 0 : index
    %2 = vector.load %arg5[%c0_3, %c0_4] : memref<1x1xf32, #tpu.memory_space<vmem>>, vector<1x1xf32>
    %cst = arith.constant 0.000000e+00 : f32
    %3 = vector.broadcast %cst : f32 to vector<1x1xf32>
    %4 = arith.subf %3, %2 : vector<1x1xf32>
    %5 = math.exp %4 : vector<1x1xf32>
    %cst_5 = arith.constant 1.000000e+00 : f32
    %6 = vector.broadcast %cst_5 : f32 to vector<1x1xf32>
    %7 = arith.addf %6, %5 : vector<1x1xf32>
    %cst_6 = arith.constant 1.000000e+00 : f32
    %8 = vector.broadcast %cst_6 : f32 to vector<1x1xf32>
    %9 = arith.divf %8, %7 : vector<1x1xf32>
    %cst_7 = arith.constant 1.1920929E-7 : f32
    %10 = vector.broadcast %cst_7 : f32 to vector<1x1xf32>
    %11 = arith.addf %9, %10 : vector<1x1xf32>
    %12 = math.log %11 : vector<1x1xf32>
    %cst_8 = arith.constant 1.1920929E-7 : f32
    %13 = vector.broadcast %cst_8 : f32 to vector<1x1xf32>
    %14 = arith.subf %13, %9 : vector<1x1xf32>
    %cst_9 = arith.constant 1.000000e+00 : f32
    %15 = vector.broadcast %cst_9 : f32 to vector<1x1xf32>
    %16 = arith.addf %15, %14 : vector<1x1xf32>
    %17 = math.log %16 : vector<1x1xf32>
    %18 = arith.subf %12, %17 : vector<1x1xf32>
    %cst_10 = arith.constant 1.1920929E-7 : f32
    %19 = vector.broadcast %cst_10 : f32 to vector<128x128xf32>
    %20 = arith.addf %1, %19 : vector<128x128xf32>
    %21 = math.log %20 : vector<128x128xf32>
    %22 = vector.broadcast %18 : vector<1x1xf32> to vector<128x128xf32>
    %23 = arith.addf %22, %21 : vector<128x128xf32>
    %cst_11 = arith.constant 1.1920929E-7 : f32
    %24 = vector.broadcast %cst_11 : f32 to vector<128x128xf32>
    %25 = arith.subf %24, %1 : vector<128x128xf32>
    %cst_12 = arith.constant 1.000000e+00 : f32
    %26 = vector.broadcast %cst_12 : f32 to vector<128x128xf32>
    %27 = arith.addf %26, %25 : vector<128x128xf32>
    %28 = math.log %27 : vector<128x128xf32>
    %29 = arith.subf %23, %28 : vector<128x128xf32>
    %cst_13 = arith.constant 1.000000e-01 : f32
    %30 = vector.broadcast %cst_13 : f32 to vector<128x128xf32>
    %31 = arith.divf %29, %30 : vector<128x128xf32>
    %cst_14 = arith.constant 0.000000e+00 : f32
    %32 = vector.broadcast %cst_14 : f32 to vector<128x128xf32>
    %33 = arith.subf %32, %31 : vector<128x128xf32>
    %34 = math.exp %33 : vector<128x128xf32>
    %cst_15 = arith.constant 1.000000e+00 : f32
    %35 = vector.broadcast %cst_15 : f32 to vector<128x128xf32>
    %36 = arith.addf %35, %34 : vector<128x128xf32>
    %cst_16 = arith.constant 1.000000e+00 : f32
    %37 = vector.broadcast %cst_16 : f32 to vector<128x128xf32>
    %38 = arith.divf %37, %36 : vector<128x128xf32>
    %cst_17 = arith.constant 1.000000e+00 : f32
    %39 = vector.broadcast %cst_17 : f32 to vector<128x128xf32>
    %40 = arith.subf %39, %38 : vector<128x128xf32>
    %cst_18 = arith.constant 1.000000e+00 : f32
    %41 = vector.broadcast %cst_18 : f32 to vector<1x1xf32>
    %42 = arith.subf %41, %9 : vector<1x1xf32>
    %43 = arith.addf %0, %40 : vector<128x128xf32>
    %44 = vector.broadcast %42 : vector<1x1xf32> to vector<128x128xf32>
    %45 = arith.divf %43, %44 : vector<128x128xf32>
    %c0_19 = arith.constant 0 : index
    %c0_20 = arith.constant 0 : index
    %46 = vector.load %arg3[%c0_19, %c0_20] : memref<128x128xf32, #tpu.memory_space<vmem>>, vector<128x128xf32>
    %cst_21 = arith.constant dense<0.000000e+00> : vector<128x128xf32>
    %47 = tpu.matmul %45, %46, %cst_21 {dimension_numbers = #tpu.dot_dimension_numbers<[1], [0], [0], [1], [0, 0, 1, 1], [], []>} : vector<128x128xf32>, vector<128x128xf32>, vector<128x128xf32> -> vector<128x128xf32>
    %c0_22 = arith.constant 0 : index
    %c0_23 = arith.constant 0 : index
    %48 = vector.load %arg4[%c0_22, %c0_23] : memref<1x128xf32, #tpu.memory_space<vmem>>, vector<1x128xf32>
    %49 = vector.broadcast %48 : vector<1x128xf32> to vector<128x128xf32>
    %50 = arith.addf %47, %49 : vector<128x128xf32>
    %c0_24 = arith.constant 0 : index
    %c0_25 = arith.constant 0 : index
    %51 = vector.load %arg6[%c0_24, %c0_25] : memref<128x128xf32, #tpu.memory_space<vmem>>, vector<128x128xf32>
    tpu.vector_store %arg6[%c0_24, %c0_25], %50 {strides = array<i32>} : memref<128x128xf32, #tpu.memory_space<vmem>>, vector<128x128xf32>,
    return
  }
  func.func @transform_0(%arg0: i32) -> (i32, i32) {
    %c0_i32 = arith.constant 0 : i32
    %c0_i32_0 = arith.constant 0 : i32
    return %arg0, %c0_i32 : i32, i32
  }
  func.func @transform_1(%arg0: i32) -> (i32, i32) {
    %c0_i32 = arith.constant 0 : i32
    %c0_i32_0 = arith.constant 0 : i32
    return %arg0, %c0_i32 : i32, i32
  }
  func.func @transform_2(%arg0: i32) -> (i32, i32) {
    %c0_i32 = arith.constant 0 : i32
    %c0_i32_0 = arith.constant 0 : i32
    %c0_i32_1 = arith.constant 0 : i32
    return %c0_i32, %c0_i32_0 : i32, i32
  }
  func.func @transform_3(%arg0: i32) -> (i32, i32) {
    %c0_i32 = arith.constant 0 : i32
    %c0_i32_0 = arith.constant 0 : i32
    %c0_i32_1 = arith.constant 0 : i32
    return %c0_i32, %c0_i32_0 : i32, i32
  }
  func.func @transform_4(%arg0: i32) -> (i32, i32) {
    %c0_i32 = arith.constant 0 : i32
    %c0_i32_0 = arith.constant 0 : i32
    %c0_i32_1 = arith.constant 0 : i32
    return %c0_i32, %c0_i32_0 : i32, i32
  }
  func.func @transform_5(%arg0: i32) -> (i32, i32) {
    %c0_i32 = arith.constant 0 : i32
    %c0_i32_0 = arith.constant 0 : i32
    return %arg0, %c0_i32 : i32, i32
  }
}

</mosaic_0001>

<bundles_post_ra>
// kernel: tpu_custom_call.1
= control target key start
LH: loop header
LB: loop body
LE: loop exit
PB: predicated region body
PF: predicated region fallthrough
CT: control target
= control target key end

     0   :  { %s1888_s0 = inlined_call_operand.hbm [shape: f32[256,128], index: 0, kind: input, shape index: {}]   ;;  %s1889_s1 = inlined_call_operand.hbm [shape: f32[256,128], index: 1, kind: input, shape index: {}]   ;;  %s1890_s2 = inlined_call_operand.hbm [shape: f32[128,128], index: 2, kind: input, shape index: {}]   ;;  %s1891_s3 = inlined_call_operand.vmem [shape: f32[1,128], index: 3, kind: input, shape index: {}]   ;;  %s1892_s4 = inlined_call_operand.<no memory space> [shape: f32[1,1], index: 4, kind: input, shape index: {}]   ;;  %s1893_s5 = inlined_call_operand.hbm [shape: f32[256,128], index: 5, kind: output, shape index: {}]  }
   0x1   :  { %1901 = sst [smem:[#allocation15_spill]] %s1888_s0  ;;  %v10_v0 = vstv %s1892_s4 }
   0x2   :  { %1902 = sst [smem:[#allocation16_spill]] %s1890_s2  ;;  %11 = vst [vmem:[#allocation2] sm:$0x1] %v10_v0 }
   0x3   :  { %12 = vsyncpa [#allocation4], 0 }
   0x4   :  { %14 = vsyncpa [#allocation4 + $0x1], 0 }
   0x5   :  { %15 = vsyncpa [#allocation7], 0 }
   0x6   :  { %17 = vsyncpa [#allocation7 + $0x1], 0 }
   0x7   :  { %18 = vsyncpa [#allocation5], 0 }
   0x8   :  { %20 = vsyncpa [#allocation5 + $0x1], 0  ;;  %s1525_s20 = smov 0   ;;  %s1527_s21 = smov 0  }
   0x9   :  { %s1529_s22 = smov 0   ;;  %s1531_s23 = smov 0  }
   0xa LB: > { %s1546_s4 = sadd.s32 4294967295, %s1481_s23   ;;  %s977_s24 = sadd.s32 4294967294, %s1481_s23   ;;  %s1481_s23 = sphi %s1531_s23, %s1925_s23   ;;  %s1477_s22 = sphi %s1529_s22, %s1924_s22   ;;  %s1473_s21 = sphi %s1527_s21, %s1923_s21   ;;  %s1469_s20 = sphi %s1525_s20, %s1922_s20  }
   0xb   : > { %p46_p0 = scmp.ne.s32.totalorder %s1473_s21, %s1469_s20  ;;  %p1898_p1 = scmp.eq.s32.totalorder %s1546_s4, 0 }
   0xc   : > { %p165_p3 = scmp.eq.s32.totalorder %s977_s24, 1  ;;  %p978_p5 = scmp.ge.s32.totalorder %s1481_s23, 1 }
   0xd   : > { %p1555_p4 = por %p1898_p1, %p46_p0  ;;  %p172_p7 = scmp.lt.s32.totalorder %s1481_s23, 3 }
   0xe   : > { %p1560_p6 = por %p165_p3, %p46_p0  ;;  %s1483_s28 = smov [#allocation8]  }
   0xf   : > { %s1903_s25 = scalar_select %p1555_p4, 1, 0 }
  0x10   : > { %s1904_s26 = scalar_select %p1560_p6, 1, 0 }
  0x11   : > { %p1565_p8 = pnand %p978_p5, %p172_p7  ;;  %s184_s29 = sshll.u32 %s1483_s28, 4  ;;  %s185_s29 = int_to_ptr.vmem [resolvable:$true] %s184_s29 }
  0x12   : > { %s1579_s6 = sadd.s32 1, %s1481_s23   ;;  %s33_s7 = sadd.s32 1, %s1477_s22 }
  0x13   : > { %p1131_p9 = pneg %p1565_p8  ;;  %s30_s8 = ssub.s32 %s1481_s23, %s1579_s6 }
  0x14   : > { %s1338_s9 = scalar_lea.vmem %s185_s29, 2048  ;;  %p1346_p5 = scmp.lt.s32.totalorder %s185_s29, %s185_s29 }
  0x15   : > { %p1574_p11 = pnand %p1131_p9, %p1898_p1  ;;  %p1339_p13 = scmp.ne.s32.totalorder %s185_s29, %s1338_s9 }
  0x16   : > { %p1347_p7 = scmp.lt.s32.totalorder %s1338_s9, %s1338_s9 }
  0x17   : > { %p1329_p12 = pneg %p1574_p11 }
  0x18   : > { %p1348_p10 = por %p1347_p7, %p1346_p5 }
  0x19   : > { %p1341_p0 = pnand %p1339_p13, %p1329_p12 }
  0x1b   : > { %p1342_p3 = pneg %p1341_p0 }
  0x1d   : > { %p1349_p2 = pnand %p1348_p10, %p1342_p3 }
  0x1f   : > { %1352 = shalt.err (!%p1349_p2)
}
  0x20   : > { %s1894_s10 = smov 128   ;;  %s1896_s11 = smov 8  }
  0x21   : > { %s1907_s2 = sld [smem:[#allocation16_spill]]  ;;  %p31_p2 = scmp.eq.s32.totalorder %s30_s8, 0 }
  0x22   : > { %p40_p9 = scmp.ne.s32.totalorder %s1477_s22, %s1473_s21  ;;  %p41_p10 = scmp.eq.s32.totalorder %s1481_s23, 0 }
  0x23   : > { %p1147_p12 = scmp.lt.s32.totalorder %s1481_s23, 2  ;;  %p1909_p0 = scmp.eq.s32.totalorder %s1546_s4, 1 }
  0x24   : > { %s1599_s14 = scalar_select %p31_p2, %s1477_s22, %s33_s7  }
  0x25   : > { %p42_p13 = por %p41_p10, %p40_p9  ;;  %p1603_p3 = por %p1909_p0, %p40_p9 }
  0x26   : > { %1908 = sst [smem:[#allocation14_spill]] %s1599_s14  ;;  %s204_s16 = sand.u32 1, %s1477_s22  }
  0x27   : > { %1134 = dma.hbm_to_vmem [thread:$0]  (!%p1574_p11), %s1907_s2, 2048, %s185_s29, [#allocation7], %s1894_s10, %s1894_s10, %s1896_s11  }
  0x28   : > { %s1910_s15 = scalar_select %p1603_p3, 1, 0 }
  0x29   : > { %s998_s17 = sshll.u32 %s1481_s23, 11  ;;  %s1609_s18 = sshll.u32 %s204_s16, 7 }
  0x2a   : > { %s1911_s0 = sld [smem:[#allocation15_spill]]  ;;  %s208_s29 = scalar_lea.vmem [#allocation3], %s1609_s18 }
  0x2b   : > { %s215_s30 = sshll.u32 %s208_s29, 4  ;;  %p1617_p11 = pnand %p1147_p12, %p42_p13  ;;  %s1621_s30 = int_to_ptr.vmem [resolvable:$true] %s215_s30 }
  0x2c   : > { %s1626_s12 = scalar_lea.hbm %s1889_s1, %s998_s17  ;;  %s1628_s13 = scalar_lea.sflag [#allocation4], %s204_s16 }
  0x2d   : > { %p1355_p7 = pneg %p1617_p11 }
  0x30   : > { %s1614_s28 = scalar_lea.hbm %s1911_s0, %s998_s17  ;;  %s1358_s10 = scalar_lea.hbm %s1911_s0, 4096 }
  0x31   : > { %s1353_s19 = scalar_lea.hbm %s1614_s28, 2048  ;;  %p1359_p10 = scmp.lt.s32.totalorder %s1614_s28, %s1911_s0 }
  0x32   : > { %p1354_p5 = scmp.ne.s32.totalorder %s1614_s28, %s1353_s19  ;;  %p1360_p12 = scmp.lt.s32.totalorder %s1358_s10, %s1353_s19 }
  0x34   : > { %p1356_p2 = pnand %p1355_p7, %p1354_p5  ;;  %p1361_p13 = por %p1360_p12, %p1359_p10 }
  0x36   : > { %p1357_p9 = pneg %p1356_p2 }
  0x38   : > { %p1362_p0 = pnand %p1361_p13, %p1357_p9 }
  0x3a   : > { %1365 = shalt.err (!%p1362_p0)
}
  0x3b   : > { %s1366_s16 = scalar_lea.vmem %s1621_s30, 2048  ;;  %s1486_s17 = smov [#allocation3]  }
  0x3c   : > { %p1367_p1 = scmp.ne.s32.totalorder %s1621_s30, %s1366_s16  ;;  %s1371_s8 = sshll.u32 %s1486_s17, 4  ;;  %s1372_s8 = int_to_ptr.vmem [resolvable:$false] %s1371_s8 }
  0x3d   : > { %s1373_s9 = scalar_lea.vmem %s1372_s8, 4096  ;;  %p1374_p6 = scmp.lt.s32.totalorder %s1621_s30, %s1372_s8 }
  0x3e   : > { %p1369_p5 = pnand %p1367_p1, %p1355_p7  ;;  %p1375_p3 = scmp.lt.s32.totalorder %s1373_s9, %s1366_s16 }
  0x40   : > { %p1370_p2 = pneg %p1369_p5  ;;  %p1376_p4 = por %p1375_p3, %p1374_p6 }
  0x42   : > { %p1377_p10 = pnand %p1376_p4, %p1370_p2 }
  0x44   : > { %1380 = shalt.err (!%p1377_p10)
}
  0x45   : > { %s1913_s2 = smov 8   ;;  %s1914_s10 = smov 128  }
  0x46   : > { %1138 = dma.hbm_to_vmem [thread:$0]  (!%p1617_p11), %s1614_s28, 2048, %s1621_s30, %s1628_s13, %s1914_s10, %s1914_s10, %s1913_s2  }
  0x47   : > { %s229_s11 = scalar_lea.vmem [#allocation6], %s1609_s18  ;;  %s225_s24 = sand.u32 1, %s1481_s23  }
  0x48   : > { %s236_s19 = sshll.u32 %s229_s11, 4  ;;  %s226_s29 = scalar_lea.sflag [#allocation7], %s225_s24  ;;  %s1660_s19 = int_to_ptr.vmem [resolvable:$true] %s236_s19 }
  0x49   : > { %s1381_s16 = scalar_lea.hbm %s1626_s12, 2048  ;;  %s1386_s9 = scalar_lea.hbm %s1889_s1, 4096 }
  0x4a   : > { %p1382_p1 = scmp.ne.s32.totalorder %s1626_s12, %s1381_s16  ;;  %p1387_p3 = scmp.lt.s32.totalorder %s1626_s12, %s1889_s1 }
  0x4b   : > { %p1388_p9 = scmp.lt.s32.totalorder %s1386_s9, %s1381_s16 }
  0x4c   : > { %p1384_p4 = pnand %p1382_p1, %p1355_p7 }
  0x4d   : > { %p1389_p12 = por %p1388_p9, %p1387_p3 }
  0x4e   : > { %p1385_p6 = pneg %p1384_p4 }
  0x50   : > { %p1390_p13 = pnand %p1389_p12, %p1385_p6 }
  0x52   : > { %1393 = shalt.err (!%p1390_p13)
}
  0x53   : > { %s1394_s18 = scalar_lea.vmem %s1660_s19, 2048  ;;  %s1487_s28 = smov [#allocation6]  }
  0x54   : > { %p1395_p0 = scmp.ne.s32.totalorder %s1660_s19, %s1394_s18  ;;  %s1399_s30 = sshll.u32 %s1487_s28, 4  ;;  %s1400_s30 = int_to_ptr.vmem [resolvable:$false] %s1399_s30 }
  0x55   : > { %s1401_s13 = scalar_lea.vmem %s1400_s30, 4096  ;;  %p1402_p10 = scmp.lt.s32.totalorder %s1660_s19, %s1400_s30 }
  0x56   : > { %p1397_p5 = pnand %p1395_p0, %p1355_p7  ;;  %p1403_p1 = scmp.lt.s32.totalorder %s1401_s13, %s1394_s18 }
  0x58   : > { %p1398_p2 = pneg %p1397_p5  ;;  %p1404_p4 = por %p1403_p1, %p1402_p10 }
  0x5a   : > { %p1405_p3 = pnand %p1404_p4, %p1398_p2 }
  0x5c   : > { %1408 = shalt.err (!%p1405_p3)
}
  0x5d   : > { %1141 = dma.hbm_to_vmem [thread:$0]  (!%p1617_p11), %s1626_s12, 2048, %s1660_s19, %s226_s29, %s1914_s10, %s1914_s10, %s1913_s2  }
  0x5e   : > { %248 = sbr.rel (%p1565_p8) target bundleno = 577 (0x241), region = 40  ;;  %s1690_s0 = sand.u32 (!%p1565_p8), 1, %s1473_s21  }
  0x5f   : > { %s1693_s14 = sshll.u32 (!%p1565_p8), %s1690_s0, 7  ;;  %s251_s11 = scalar_lea.sflag (!%p1565_p8), [#allocation4], %s1690_s0 }
  0x60   : > { %s1697_s7 = scalar_lea.vmem (!%p1565_p8), [#allocation3], %s1693_s14  ;;  %p1915_p7 = scmp.ne.s32.totalorder (!%p1565_p8), %s1903_s25, 0 }
  0x63   : > { %1452 = dma.done.wait (%p1915_p7), %s251_s11, 2048  }
  0x64   : > { %1454 = vsyncadd (%p1915_p7), %s251_s11, 4294965248  ;;  %s259_s27 = sand.u32 1, %s1546_s4   ;;  %s1705_s2 = scalar_lea.vmem [#allocation6], %s1693_s14 }
  0x65   : > { %s260_s12 = scalar_lea.sflag [#allocation7], %s259_s27 }
  0x66   : > { %1456 = dma.done.wait (%p1915_p7), %s260_s12, 2048  }
  0x67   : > { %1458 = vsyncadd (%p1915_p7), %s260_s12, 4294965248  ;;  %p1916_p8 = scmp.eq.s32.totalorder %s1546_s4, 0 }
  0x69   : > { %1460 = dma.done.wait (%p1916_p8), [#allocation7], 2048   ;;  %p1917_p11 = pmov %p1916_p8 }
  0x6a   : > { %v1488_v1 = vmov 0   ;;  %v334_v2 = vld [vmem:[#allocation2] sm:$0x1]  ;;  %v398_v11 = vlaneseq  ;;  %v688_v23 = vld [vmem:[#allocation8 + $0x70] sm:$0xff]  ;;  %v687_v24 = vld [vmem:[#allocation8 + $0x68] sm:$0xff]  ;;  %s1820_s19 = scalar_lea.vmem [#allocation9], %s1693_s14 }
  0x6b   : > { %1462 = vsyncadd (%p1917_p11), [#allocation7], 4294965248  ;;  %1188 = vset.pattern.permute.xlu0 %v1488_v1  ;;  %v335_v3 = vsub.f32 0.0, %v334_v2  ;;  %v689_v22 = vld [vmem:[#allocation8 + $0x78] sm:$0xff]  ;;  %v686_v25 = vld [vmem:[#allocation8 + $0x60] sm:$0xff]  ;;  %s1000_s24 = sshll.u32 %s1546_s4, 11 }
  0x6c   : > { %v399_v12 = vshrl.u32 %v398_v11, 7  ;;  %1033 = vmatprep.subr.mxu0 %v689_v22  ;;  %1089 = vmatprep.subr.mxu1 %v689_v22  ;;  %v685_v26 = vld [vmem:[#allocation8 + $0x58] sm:$0xff]  ;;  %v684_v27 = vld [vmem:[#allocation8 + $0x50] sm:$0xff]  ;;  %v683_v28 = vld [vmem:[#allocation8 + $0x48] sm:$0xff]  ;;  %s872_s29 = sshll.u32 %s1820_s19, 4  ;;  %s1841_s8 = scalar_lea.hbm %s1893_s5, %s1000_s24  ;;  %s1843_s29 = int_to_ptr.vmem [resolvable:$true] %s872_s29 }
  0x6d   : > { %v336_v4 = vmul.f32 1.442695, %v335_v3  ;;  %1034 = vmatpush3.msra.mxu0 %v689_v22  ;;  %1105 = vmatpush3.msra.mxu1 %v689_v22  ;;  %v682_v29 = vld [vmem:[#allocation8 + $0x40] sm:$0xff]  ;;  %v681_v30 = vld [vmem:[#allocation8 + $0x38] sm:$0xff]  ;;  %v680_v31 = vld [vmem:[#allocation8 + $0x30] sm:$0xff]  ;;  %s859_s9 = scalar_lea.sflag [#allocation5], %s1690_s0 }
  0x6e   : > { %v400_v17 = vsub.s32 0, %v399_v12  ;;  %1035 = vmatprep.subr.mxu0 %v688_v23  ;;  %1090 = vmatprep.subr.mxu1 %v688_v23  ;;  %v679_v32 = vld [vmem:[#allocation8 + $0x28] sm:$0xff]  ;;  %v678_v33 = vld [vmem:[#allocation8 + $0x20] sm:$0xff]  ;;  %v677_v34 = vld [vmem:[#allocation8 + $0x18] sm:$0xff]  ;;  %s1409_s4 = scalar_lea.vmem %s1843_s29, 2048  ;;  %p1918_p9 = scmp.ne.s32.totalorder %s1910_s15, 0 }
  0x6f   : > { %1189 = vpow2.f32 %v336_v4  ;;  %1036 = vmatpush3.msra.mxu0 %v688_v23  ;;  %1106 = vmatpush3.msra.mxu1 %v688_v23  ;;  %v676_v35 = vld [vmem:[#allocation8 + $0x10] sm:$0xff]  ;;  %v675_v36 = vld [vmem:[#allocation8 + $0x8] sm:$0xff]  ;;  %v674_v37 = vld [vmem:[#allocation8] sm:$0xff]  ;;  %p1410_p6 = scmp.ne.s32.totalorder %s1843_s29, %s1409_s4  ;;  %s1489_s18 = smov [#allocation9]  }
  0x70   : > { %1037 = vmatprep.subr.mxu0 %v687_v24  ;;  %1091 = vmatprep.subr.mxu1 %v687_v24  ;;  %v318_v38 = vld [vmem:[%s1705_s2] sm:$0xff]  ;;  %v319_v41 = vld [vmem:[%s1705_s2 + $0x8] sm:$0xff]  ;;  %v320_v48 = vld [vmem:[%s1705_s2 + $0x10] sm:$0xff]  ;;  %s1413_s28 = sshll.u32 %s1489_s18, 4  ;;  %s1414_s28 = int_to_ptr.vmem [resolvable:$false] %s1413_s28 }
  0x71   : > { %1038 = vmatpush3.msra.mxu0 %v687_v24  ;;  %1107 = vmatpush3.msra.mxu1 %v687_v24  ;;  %v326_v39 = vld [vmem:[%s1705_s2 + $0x40] sm:$0xff]  ;;  %v422_v40 = vsub.f32 1.1920929e-07, %v318_v38  ;;  %v349_v43 = vadd.f32 1.1920929e-07, %v318_v38  ;;  %v327_v44 = vld [vmem:[%s1705_s2 + $0x48] sm:$0xff]  ;;  %v423_v46 = vsub.f32 1.1920929e-07, %v319_v41  ;;  %v350_v51 = vadd.f32 1.1920929e-07, %v319_v41  ;;  %p1411_p12 = pnand %p1410_p6, %p1918_p9  ;;  %p1416_p0 = scmp.lt.s32.totalorder %s1843_s29, %s1414_s28 }
  0x72   : > { %1039 = vmatprep.subr.mxu0 %v686_v25  ;;  %1092 = vmatprep.subr.mxu1 %v686_v25  ;;  %v430_v42 = vsub.f32 1.1920929e-07, %v326_v39  ;;  %v357_v45 = vadd.f32 1.1920929e-07, %v326_v39  ;;  %v431_v50 = vsub.f32 1.1920929e-07, %v327_v44  ;;  %v328_v52 = vld [vmem:[%s1705_s2 + $0x50] sm:$0xff]  ;;  %v424_v54 = vsub.f32 1.1920929e-07, %v320_v48  ;;  %v321_v56 = vld [vmem:[%s1705_s2 + $0x18] sm:$0xff] }
  0x73   : > { %1040 = vmatpush3.msra.mxu0 %v686_v25  ;;  %1108 = vmatpush3.msra.mxu1 %v686_v25  ;;  %v438_v47 = vadd.f32 1.0, %v422_v40  ;;  %v439_v53 = vadd.f32 1.0, %v423_v46  ;;  %v358_v55 = vadd.f32 1.1920929e-07, %v327_v44  ;;  %v432_v58 = vsub.f32 1.1920929e-07, %v328_v52  ;;  %v329_v60 = vld [vmem:[%s1705_s2 + $0x58] sm:$0xff]  ;;  %v322_v0 = vld [vmem:[%s1705_s2 + $0x20] sm:$0xff]  ;;  %p1412_p13 = pneg %p1411_p12 }
  0x74   : > { %1041 = vmatprep.subr.mxu0 %v685_v26  ;;  %1093 = vmatprep.subr.mxu1 %v685_v26  ;;  %v446_v49 = vadd.f32 1.0, %v430_v42  ;;  %v447_v57 = vadd.f32 1.0, %v431_v50  ;;  %v351_v59 = vadd.f32 1.1920929e-07, %v320_v48  ;;  %v440_v61 = vadd.f32 1.0, %v424_v54  ;;  %v330_v4 = vld [vmem:[%s1705_s2 + $0x60] sm:$0xff]  ;;  %v331_v12 = vld [vmem:[%s1705_s2 + $0x68] sm:$0xff] }
  0x75   : > { %1042 = vmatpush3.msra.mxu0 %v685_v26  ;;  %1109 = vmatpush3.msra.mxu1 %v685_v26  ;;  %v425_v62 = vsub.f32 1.1920929e-07, %v321_v56  ;;  %v359_v63 = vadd.f32 1.1920929e-07, %v328_v52  ;;  %v448_v1 = vadd.f32 1.0, %v432_v58  ;;  %v433_v2 = vsub.f32 1.1920929e-07, %v329_v60  ;;  %v332_v24 = vld [vmem:[%s1705_s2 + $0x70] sm:$0xff]  ;;  %s1415_s30 = scalar_lea.vmem %s1414_s28, 4096 }
  0x76   : > { %1043 = vmatprep.subr.mxu0 %v684_v27  ;;  %1094 = vmatprep.subr.mxu1 %v684_v27  ;;  %v352_v3 = vadd.f32 1.1920929e-07, %v321_v56  ;;  %v353_v11 = vadd.f32 1.1920929e-07, %v322_v0  ;;  %v363_v40 = vadd.f32 1.1920929e-07, %v332_v24  ;;  %p1417_p5 = scmp.lt.s32.totalorder %s1415_s30, %s1409_s4 }
  0x77   : > { %1044 = vmatpush3.msra.mxu0 %v684_v27  ;;  %1110 = vmatpush3.msra.mxu1 %v684_v27 }
  0x78   : > { %1045 = vmatprep.subr.mxu0 %v683_v28  ;;  %1095 = vmatprep.subr.mxu1 %v683_v28  ;;  %p1418_p2 = por %p1417_p5, %p1416_p0 }
  0x79   : > { %1046 = vmatpush3.msra.mxu0 %v683_v28  ;;  %1111 = vmatpush3.msra.mxu1 %v683_v28 }
  0x7a   : > { %1047 = vmatprep.subr.mxu0 %v682_v29  ;;  %1096 = vmatprep.subr.mxu1 %v682_v29  ;;  %p1419_p10 = pnand %p1418_p2, %p1412_p13 }
  0x7b   : > { %1048 = vmatpush3.msra.mxu0 %v682_v29  ;;  %1112 = vmatpush3.msra.mxu1 %v682_v29  ;;  %v362_v29 = vadd.f32 1.1920929e-07, %v331_v12 }
  0x7c   : > { %v1190_v5 = vpop.eup %1189  ;;  %1049 = vmatprep.subr.mxu0 %v681_v30  ;;  %1097 = vmatprep.subr.mxu1 %v681_v30 }
  0x7d   : > { %v338_v6 = vadd.f32 1.0, %v1190_v5  ;;  %1050 = vmatpush3.msra.mxu0 %v681_v30  ;;  %1113 = vmatpush3.msra.mxu1 %v681_v30  ;;  %v441_v5 = vadd.f32 1.0, %v425_v62  ;;  %v325_v30 = vld [vmem:[%s1705_s2 + $0x38] sm:$0xff] }
  0x7e   : > { %1051 = vmatprep.subr.mxu0 %v680_v31  ;;  %1098 = vmatprep.subr.mxu1 %v680_v31  ;;  %v429_v38 = vsub.f32 1.1920929e-07, %v325_v30  ;;  %v356_v44 = vadd.f32 1.1920929e-07, %v325_v30 }
  0x7f   : > { %1191 = vrcp.f32 %v338_v6  ;;  %1052 = vmatpush3.msra.mxu0 %v680_v31  ;;  %1114 = vmatpush3.msra.mxu1 %v680_v31  ;;  %v426_v6 = vsub.f32 1.1920929e-07, %v322_v0 }
  0x80   : > { %1053 = vmatprep.subr.mxu0 %v679_v32  ;;  %1099 = vmatprep.subr.mxu1 %v679_v32  ;;  %v445_v46 = vadd.f32 1.0, %v429_v38 }
  0x81   : > { %1054 = vmatpush3.msra.mxu0 %v679_v32  ;;  %1115 = vmatpush3.msra.mxu1 %v679_v32 }
  0x82   : > { %1055 = vmatprep.subr.mxu0 %v678_v33  ;;  %1100 = vmatprep.subr.mxu1 %v678_v33 }
  0x83   : > { %1056 = vmatpush3.msra.mxu0 %v678_v33  ;;  %1116 = vmatpush3.msra.mxu1 %v678_v33  ;;  %v436_v33 = vsub.f32 1.1920929e-07, %v332_v24 }
  0x84   : > { %1057 = vmatprep.subr.mxu0 %v677_v34  ;;  %1101 = vmatprep.subr.mxu1 %v677_v34 }
  0x85   : > { %1058 = vmatpush3.msra.mxu0 %v677_v34  ;;  %1117 = vmatpush3.msra.mxu1 %v677_v34  ;;  %v452_v42 = vadd.f32 1.0, %v436_v33 }
  0x86   : > { %1059 = vmatprep.subr.mxu0 %v676_v35  ;;  %1102 = vmatprep.subr.mxu1 %v676_v35 }
  0x87   : > { %1060 = vmatpush3.msra.mxu0 %v676_v35  ;;  %1118 = vmatpush3.msra.mxu1 %v676_v35 }
  0x88   : > { %1061 = vmatprep.subr.mxu0 %v675_v36  ;;  %1103 = vmatprep.subr.mxu1 %v675_v36 }
  0x89   : > { %1062 = vmatpush3.msra.mxu0 %v675_v36  ;;  %1119 = vmatpush3.msra.mxu1 %v675_v36 }
  0x8a   : > { %1063 = vmatprep.subr.mxu0 %v674_v37  ;;  %1104 = vmatprep.subr.mxu1 %v674_v37 }
  0x8b   : > { %1064 = vmatpush3.msra.mxu0 %v674_v37  ;;  %1120 = vmatpush3.msra.mxu1 %v674_v37 }
  0x8c   : > { %v1192_v7 = vpop.eup %1191 }
  0x8d   : > { %v341_v8 = vadd.f32 1.1920929e-07, %v1192_v7  ;;  %v344_v9 = vsub.f32 1.1920929e-07, %v1192_v7  ;;  %v631_v19 = vsub.f32 1.0, %v1192_v7  ;;  %v360_v7 = vadd.f32 1.1920929e-07, %v329_v60 }
  0x8f   : > { %1193 = vlog2.f32 %v341_v8  ;;  %v345_v10 = vadd.f32 1.0, %v344_v9  ;;  %v652_v21 = vrot.slane %v631_v19, %v400_v17  ;;  %v323_v8 = vld [vmem:[%s1705_s2 + $0x28] sm:$0xff]  ;;  %v449_v9 = vadd.f32 1.0, %v433_v2 }
  0x90   : > { %v354_v23 = vadd.f32 1.1920929e-07, %v323_v8 }
  0x91   : > { %1195 = vlog2.f32 %v345_v10  ;;  %v434_v10 = vsub.f32 1.1920929e-07, %v330_v4 }
  0x92   : > { %1197 = vlog2.f32 %v349_v43 }
  0x93   : > { %1199 = vlog2.f32 %v357_v45 }
  0x94   : > { %1201 = vlog2.f32 %v438_v47 }
  0x95   : > { %1203 = vlog2.f32 %v446_v49  ;;  %v333_v49 = vld [vmem:[%s1705_s2 + $0x78] sm:$0xff] }
  0x96   : > { %1205 = vlog2.f32 %v350_v51  ;;  %v437_v0 = vsub.f32 1.1920929e-07, %v333_v49 }
  0x97   : > { %1207 = vlog2.f32 %v439_v53  ;;  %v364_v53 = vadd.f32 1.1920929e-07, %v333_v49 }
  0x98   : > { %1209 = vlog2.f32 %v358_v55 }
  0x99   : > { %1211 = vlog2.f32 %v447_v57 }
  0x9a   : > { %1213 = vlog2.f32 %v351_v59 }
  0x9b   : > { %1215 = vlog2.f32 %v440_v61 }
  0x9c   : > { %v1194_v13 = vpop.eup %1193  ;;  %1217 = vlog2.f32 %v359_v63 }
  0x9d   : > { %v343_v14 = vmul.f32 0.6931472, %v1194_v13  ;;  %1219 = vlog2.f32 %v448_v1 }
  0x9e   : > { %v1196_v15 = vpop.eup %1195  ;;  %1221 = vlog2.f32 %v352_v3 }
  0x9f   : > { %v347_v16 = vmul.f32 0.6931472, %v1196_v15  ;;  %v1727_v13 = vpop.eup %1197  ;;  %1223 = vlog2.f32 %v441_v5  ;;  %v427_v15 = vsub.f32 1.1920929e-07, %v323_v8 }
  0xa0   : > { %1225 = vlog2.f32 %v360_v7  ;;  %v366_v59 = vmul.f32 0.6931472, %v1727_v13 }
  0xa1   : > { %v348_v18 = vsub.f32 %v343_v14, %v347_v16  ;;  %v442_v14 = vadd.f32 1.0, %v426_v6  ;;  %v1200_v16 = vpop.eup %1199  ;;  %1227 = vlog2.f32 %v449_v9  ;;  %v443_v26 = vadd.f32 1.0, %v427_v15 }
  0xa2   : > { %v1202_v19 = vpop.eup %1201  ;;  %1229 = vlog2.f32 %v353_v11  ;;  %v382_v60 = vmul.f32 0.6931472, %v1200_v16  ;;  %v453_v16 = vadd.f32 1.0, %v437_v0 }
  0xa3   : > { %v401_v20 = vrot.slane %v348_v18, %v400_v17  ;;  %v361_v17 = vadd.f32 1.1920929e-07, %v330_v4  ;;  %v324_v18 = vld [vmem:[%s1705_s2 + $0x30] sm:$0xff]  ;;  %v1204_v22 = vpop.eup %1203  ;;  %1231 = vlog2.f32 %v442_v14  ;;  %v455_v62 = vmul.f32 0.6931472, %v1202_v19 }
  0xa4   : > { %v1206_v25 = vpop.eup %1205  ;;  %v428_v27 = vsub.f32 1.1920929e-07, %v324_v18  ;;  %v355_v35 = vadd.f32 1.1920929e-07, %v324_v18  ;;  %v471_v63 = vmul.f32 0.6931472, %v1204_v22 }
  0xa5   : > { %403 = vperm.xlu0 %1188, %v401_v20   ;;  %v450_v20 = vadd.f32 1.0, %v434_v10  ;;  %v1208_v28 = vpop.eup %1207  ;;  %1233 = vlog2.f32 %v361_v17  ;;  %v368_v2 = vmul.f32 0.6931472, %v1206_v25 }
  0xa6   : > { %v1210_v31 = vpop.eup %1209  ;;  %v444_v37 = vadd.f32 1.0, %v428_v27  ;;  %v457_v3 = vmul.f32 0.6931472, %v1208_v28 }
  0xa7   : > { %1235 = vlog2.f32 %v450_v20  ;;  %v1212_v34 = vpop.eup %1211  ;;  %v384_v4 = vmul.f32 0.6931472, %v1210_v31 }
  0xa8   : > { %1237 = vlog2.f32 %v354_v23  ;;  %v1214_v36 = vpop.eup %1213  ;;  %v473_v6 = vmul.f32 0.6931472, %v1212_v34 }
  0xa9   : > { %654 = vperm.xlu0 %1188, %v652_v21   ;;  %v435_v21 = vsub.f32 1.1920929e-07, %v331_v12  ;;  %1239 = vlog2.f32 %v443_v26  ;;  %v1216_v39 = vpop.eup %1215  ;;  %v370_v7 = vmul.f32 0.6931472, %v1214_v36 }
  0xaa   : > { %1241 = vlog2.f32 %v362_v29  ;;  %v1218_v41 = vpop.eup %1217  ;;  %v459_v8 = vmul.f32 0.6931472, %v1216_v39 }
  0xab   : > { %v451_v32 = vadd.f32 1.0, %v435_v21  ;;  %v1220_v43 = vpop.eup %1219  ;;  %v386_v10 = vmul.f32 0.6931472, %v1218_v41 }
  0xac   : > { %v1222_v45 = vpop.eup %1221  ;;  %v475_v11 = vmul.f32 0.6931472, %v1220_v43 }
  0xad   : > { %1243 = vlog2.f32 %v451_v32  ;;  %v1224_v47 = vpop.eup %1223  ;;  %v372_v12 = vmul.f32 0.6931472, %v1222_v45 }
  0xae   : > { %1245 = vlog2.f32 %v355_v35  ;;  %v1226_v48 = vpop.eup %1225  ;;  %v461_v15 = vmul.f32 0.6931472, %v1224_v47 }
  0xaf   : > { %1247 = vlog2.f32 %v444_v37  ;;  %v1228_v50 = vpop.eup %1227  ;;  %v388_v13 = vmul.f32 0.6931472, %v1226_v48 }
  0xb0   : > { %1249 = vlog2.f32 %v363_v40  ;;  %v1230_v51 = vpop.eup %1229  ;;  %v477_v18 = vmul.f32 0.6931472, %v1228_v50 }
  0xb1   : > { %1251 = vlog2.f32 %v452_v42  ;;  %v1232_v52 = vpop.eup %1231  ;;  %v374_v19 = vmul.f32 0.6931472, %v1230_v51 }
  0xb2   : > { %1253 = vlog2.f32 %v356_v44  ;;  %v1234_v54 = vpop.eup %1233  ;;  %v1734_v20 = vmul.f32 0.6931472, %v1232_v52 }
  0xb3   : > { %1255 = vlog2.f32 %v445_v46  ;;  %v390_v22 = vmul.f32 0.6931472, %v1234_v54 }
  0xb4   : > { %v1236_v55 = vpop.eup %1235  ;;  %1257 = vlog2.f32 %v364_v53 }
  0xb5   : > { %v1238_v56 = vpop.eup %1237  ;;  %v1736_v23 = vmul.f32 0.6931472, %v1236_v55  ;;  %1259 = vlog2.f32 %v453_v16 }
  0xb6   : > { %v1240_v57 = vpop.eup %1239  ;;  %v376_v24 = vmul.f32 0.6931472, %v1238_v56 }
  0xb7   : > { %v1242_v58 = vpop.eup %1241  ;;  %v1738_v25 = vmul.f32 0.6931472, %v1240_v57 }
  0xb8   : > { %v392_v26 = vmul.f32 0.6931472, %v1242_v58 }
  0xba   : > { %v1244_v61 = vpop.eup %1243 }
  0xbb   : > { %v1246_v1 = vpop.eup %1245  ;;  %v1740_v27 = vmul.f32 0.6931472, %v1244_v61 }
  0xbc   : > { %v1248_v5 = vpop.eup %1247  ;;  %v378_v28 = vmul.f32 0.6931472, %v1246_v1 }
  0xbd   : > { %v1250_v9 = vpop.eup %1249  ;;  %v1742_v29 = vmul.f32 0.6931472, %v1248_v5 }
  0xbe   : > { %v1252_v14 = vpop.eup %1251  ;;  %v1744_v30 = vmul.f32 0.6931472, %v1250_v9 }
  0xbf   : > { %v1254_v17 = vpop.eup %1253  ;;  %v1748_v32 = vmul.f32 0.6931472, %v1252_v14 }
  0xc0   : > { %v1256_v21 = vpop.eup %1255  ;;  %v1750_v33 = vmul.f32 0.6931472, %v1254_v17 }
  0xc1   : > { %v1752_v34 = vmul.f32 0.6931472, %v1256_v21  ;;  %v1258_v39 = vpop.eup %1257 }
  0xc2   : > { %v1762_v55 = vmul.f32 0.6931472, %v1258_v39 }
 0x120   : > { %v1746_v31 = vpop.permute.xlu0 %403 }
 0x121   : > { %v406_v35 = vadd.f32 %v1746_v31, %v366_v59  ;;  %v414_v36 = vadd.f32 %v1746_v31, %v382_v60  ;;  %v407_v37 = vadd.f32 %v1746_v31, %v368_v2  ;;  %v415_v38 = vadd.f32 %v1746_v31, %v384_v4 }
 0x122   : > { %v408_v40 = vadd.f32 %v1746_v31, %v370_v7  ;;  %v416_v41 = vadd.f32 %v1746_v31, %v386_v10  ;;  %v409_v42 = vadd.f32 %v1746_v31, %v372_v12  ;;  %v417_v43 = vadd.f32 %v1746_v31, %v388_v13 }
 0x123   : > { %v486_v44 = vsub.f32 %v406_v35, %v455_v62  ;;  %v494_v45 = vsub.f32 %v414_v36, %v471_v63  ;;  %v487_v46 = vsub.f32 %v407_v37, %v457_v3  ;;  %v495_v47 = vsub.f32 %v415_v38, %v473_v6 }
 0x124   : > { %v488_v48 = vsub.f32 %v408_v40, %v459_v8  ;;  %v496_v49 = vsub.f32 %v416_v41, %v475_v11  ;;  %v489_v50 = vsub.f32 %v409_v42, %v461_v15  ;;  %v497_v51 = vsub.f32 %v417_v43, %v477_v18  ;;  %v1260_v18 = vpop.eup %1259 }
 0x125   : > { %v503_v52 = vmul.f32 10.0, %v486_v44  ;;  %v511_v53 = vmul.f32 10.0, %v494_v45  ;;  %v504_v54 = vmul.f32 10.0, %v487_v46  ;;  %v512_v56 = vmul.f32 10.0, %v495_v47 }
 0x126   : > { %v505_v57 = vmul.f32 10.0, %v488_v48  ;;  %v513_v58 = vmul.f32 10.0, %v496_v49  ;;  %v506_v59 = vmul.f32 10.0, %v489_v50  ;;  %v514_v62 = vmul.f32 10.0, %v497_v51  ;;  %v655_v50 = vpop.permute.xlu0 %654 }
 0x127   : > { %v519_v60 = vsub.f32 0.0, %v503_v52  ;;  %v527_v61 = vsub.f32 0.0, %v511_v53  ;;  %v520_v0 = vsub.f32 0.0, %v504_v54  ;;  %v528_v63 = vsub.f32 0.0, %v512_v56 }
 0x128   : > { %v521_v1 = vsub.f32 0.0, %v505_v57  ;;  %v529_v2 = vsub.f32 0.0, %v513_v58  ;;  %v522_v3 = vsub.f32 0.0, %v506_v59  ;;  %v410_v7 = vadd.f32 %v1746_v31, %v374_v19 }
 0x129   : > { %v535_v4 = vmul.f32 1.442695, %v519_v60  ;;  %v551_v5 = vmul.f32 1.442695, %v527_v61  ;;  %v537_v6 = vmul.f32 1.442695, %v520_v0  ;;  %v418_v11 = vadd.f32 %v1746_v31, %v390_v22 }
 0x12a   : > { %v553_v8 = vmul.f32 1.442695, %v528_v63  ;;  %v539_v9 = vmul.f32 1.442695, %v521_v1  ;;  %v555_v10 = vmul.f32 1.442695, %v529_v2  ;;  %v490_v15 = vsub.f32 %v410_v7, %v1734_v20 }
 0x12b   : > { %1261 = vpow2.f32 %v535_v4  ;;  %v541_v12 = vmul.f32 1.442695, %v522_v3  ;;  %v530_v14 = vsub.f32 0.0, %v514_v62  ;;  %v498_v13 = vsub.f32 %v418_v11, %v1736_v23 }
 0x12c   : > { %1263 = vpow2.f32 %v551_v5  ;;  %v411_v16 = vadd.f32 %v1746_v31, %v376_v24  ;;  %v419_v17 = vadd.f32 %v1746_v31, %v392_v26  ;;  %v507_v21 = vmul.f32 10.0, %v490_v15 }
 0x12d   : > { %1265 = vpow2.f32 %v537_v6  ;;  %v557_v19 = vmul.f32 1.442695, %v530_v14  ;;  %v412_v35 = vadd.f32 %v1746_v31, %v378_v28  ;;  %v515_v22 = vmul.f32 10.0, %v498_v13 }
 0x12e   : > { %1267 = vpow2.f32 %v553_v8  ;;  %v491_v36 = vsub.f32 %v411_v16, %v1738_v25  ;;  %v499_v37 = vsub.f32 %v419_v17, %v1740_v27  ;;  %v523_v20 = vsub.f32 0.0, %v507_v21 }
 0x12f   : > { %1269 = vpow2.f32 %v539_v9  ;;  %v492_v23 = vsub.f32 %v412_v35, %v1742_v29  ;;  %v420_v24 = vadd.f32 %v1746_v31, %v1744_v30  ;;  %v531_v26 = vsub.f32 0.0, %v515_v22  ;;  %v302_v22 = vld [vmem:[%s1697_s7] sm:$0xff] }
 0x130   : > { %1271 = vpow2.f32 %v555_v10  ;;  %v508_v38 = vmul.f32 10.0, %v491_v36  ;;  %v516_v39 = vmul.f32 10.0, %v499_v37  ;;  %v543_v40 = vmul.f32 1.442695, %v523_v20  ;;  %v310_v20 = vld [vmem:[%s1697_s7 + $0x40] sm:$0xff] }
 0x131   : > { %1273 = vpow2.f32 %v541_v12  ;;  %v509_v28 = vmul.f32 10.0, %v492_v23  ;;  %v500_v41 = vsub.f32 %v420_v24, %v1748_v32  ;;  %v559_v25 = vmul.f32 1.442695, %v531_v26  ;;  %v303_v26 = vld [vmem:[%s1697_s7 + $0x8] sm:$0xff] }
 0x132   : > { %1275 = vpow2.f32 %v557_v19  ;;  %v524_v42 = vsub.f32 0.0, %v508_v38  ;;  %v532_v27 = vsub.f32 0.0, %v516_v39  ;;  %v413_v29 = vadd.f32 %v1746_v31, %v1750_v33 }
 0x133   : > { %1277 = vpow2.f32 %v543_v40  ;;  %v525_v43 = vsub.f32 0.0, %v509_v28  ;;  %v517_v44 = vmul.f32 10.0, %v500_v41  ;;  %v421_v32 = vadd.f32 %v1746_v31, %v1762_v55  ;;  %v311_v28 = vld [vmem:[%s1697_s7 + $0x48] sm:$0xff] }
 0x134   : > { %1279 = vpow2.f32 %v559_v25  ;;  %v545_v30 = vmul.f32 1.442695, %v524_v42  ;;  %v561_v45 = vmul.f32 1.442695, %v532_v27  ;;  %v493_v48 = vsub.f32 %v413_v29, %v1752_v34  ;;  %v304_v27 = vld [vmem:[%s1697_s7 + $0x10] sm:$0xff] }
 0x135   : > { %v547_v46 = vmul.f32 1.442695, %v525_v43  ;;  %v533_v47 = vsub.f32 0.0, %v517_v44  ;;  %v485_v49 = vmul.f32 0.6931472, %v1260_v18 }
 0x136   : > { %1281 = vpow2.f32 %v545_v30  ;;  %v510_v33 = vmul.f32 10.0, %v493_v48 }
 0x137   : > { %1283 = vpow2.f32 %v561_v45  ;;  %v563_v51 = vmul.f32 1.442695, %v533_v47  ;;  %v501_v58 = vsub.f32 %v421_v32, %v485_v49  ;;  %v312_v45 = vld [vmem:[%s1697_s7 + $0x50] sm:$0xff]  ;;  %v305_v49 = vld [vmem:[%s1697_s7 + $0x18] sm:$0xff] }
 0x138   : > { %v1262_v52 = vpop.eup %1261  ;;  %1285 = vpow2.f32 %v547_v46  ;;  %v526_v0 = vsub.f32 0.0, %v510_v33 }
 0x139   : > { %v1264_v53 = vpop.eup %1263  ;;  %v567_v54 = vadd.f32 1.0, %v1262_v52  ;;  %1287 = vpow2.f32 %v563_v51  ;;  %v518_v1 = vmul.f32 10.0, %v501_v58 }
 0x13a   : > { %v1266_v56 = vpop.eup %1265  ;;  %1289 = vrcp.f32 %v655_v50  ;;  %v575_v57 = vadd.f32 1.0, %v1264_v53  ;;  %v549_v8 = vmul.f32 1.442695, %v526_v0 }
 0x13b   : > { %v1268_v59 = vpop.eup %1267  ;;  %1291 = vrcp.f32 %v567_v54  ;;  %v568_v34 = vadd.f32 1.0, %v1266_v56  ;;  %v534_v10 = vsub.f32 0.0, %v518_v1  ;;  %v313_v54 = vld [vmem:[%s1697_s7 + $0x58] sm:$0xff] }
 0x13c   : > { %v1270_v60 = vpop.eup %1269  ;;  %1293 = vrcp.f32 %v575_v57  ;;  %v576_v31 = vadd.f32 1.0, %v1268_v59  ;;  %v306_v59 = vld [vmem:[%s1697_s7 + $0x20] sm:$0xff] }
 0x13d   : > { %v1272_v55 = vpop.eup %1271  ;;  %1295 = vrcp.f32 %v568_v34  ;;  %v569_v61 = vadd.f32 1.0, %v1270_v60  ;;  %v565_v18 = vmul.f32 1.442695, %v534_v10 }
 0x13e   : > { %v1274_v62 = vpop.eup %1273  ;;  %1297 = vrcp.f32 %v576_v31  ;;  %v577_v63 = vadd.f32 1.0, %v1272_v55 }
 0x13f   : > { %v1276_v2 = vpop.eup %1275  ;;  %1299 = vrcp.f32 %v569_v61  ;;  %v570_v3 = vadd.f32 1.0, %v1274_v62  ;;  %v314_v61 = vld [vmem:[%s1697_s7 + $0x60] sm:$0xff] }
 0x140   : > { %v1278_v4 = vpop.eup %1277  ;;  %1301 = vrcp.f32 %v577_v63  ;;  %v578_v5 = vadd.f32 1.0, %v1276_v2 }
 0x141   : > { %v1280_v6 = vpop.eup %1279  ;;  %1303 = vrcp.f32 %v570_v3  ;;  %v571_v7 = vadd.f32 1.0, %v1278_v4 }
 0x142   : > { %1305 = vrcp.f32 %v578_v5  ;;  %v579_v9 = vadd.f32 1.0, %v1280_v6  ;;  %v307_v5 = vld [vmem:[%s1697_s7 + $0x28] sm:$0xff] }
 0x143   : > { %v1282_v11 = vpop.eup %1281  ;;  %1307 = vrcp.f32 %v571_v7 }
 0x144   : > { %v1284_v12 = vpop.eup %1283  ;;  %1309 = vrcp.f32 %v579_v9  ;;  %v572_v14 = vadd.f32 1.0, %v1282_v11  ;;  %v315_v11 = vld [vmem:[%s1697_s7 + $0x68] sm:$0xff] }
 0x145   : > { %v1286_v15 = vpop.eup %1285  ;;  %v580_v13 = vadd.f32 1.0, %v1284_v12  ;;  %1311 = vpow2.f32 %v549_v8 }
 0x146   : > { %v1288_v16 = vpop.eup %1287  ;;  %1313 = vrcp.f32 %v572_v14  ;;  %v573_v17 = vadd.f32 1.0, %v1286_v15 }
 0x147   : > { %v1782_v19 = vpop.eup %1289  ;;  %1315 = vrcp.f32 %v580_v13  ;;  %v581_v21 = vadd.f32 1.0, %v1288_v16  ;;  %v308_v13 = vld [vmem:[%s1697_s7 + $0x30] sm:$0xff] }
 0x148   : > { %v1292_v35 = vpop.eup %1291  ;;  %1317 = vrcp.f32 %v573_v17 }
 0x149   : > { %v1294_v36 = vpop.eup %1293  ;;  %v615_v37 = vsub.f32 1.0, %v1292_v35  ;;  %1319 = vrcp.f32 %v581_v21  ;;  %v316_v35 = vld [vmem:[%s1697_s7 + $0x70] sm:$0xff] }
 0x14a   : > { %v1296_v23 = vpop.eup %1295  ;;  %v623_v24 = vsub.f32 1.0, %v1294_v36  ;;  %1321 = vpow2.f32 %v565_v18 }
 0x14b   : > { %v1298_v38 = vpop.eup %1297  ;;  %v632_v39 = vadd.f32 %v615_v37, %v302_v22  ;;  %v616_v40 = vsub.f32 1.0, %v1296_v23 }
 0x14c   : > { %v1300_v41 = vpop.eup %1299  ;;  %v640_v25 = vadd.f32 %v623_v24, %v310_v20  ;;  %v624_v42 = vsub.f32 1.0, %v1298_v38 }
 0x14d   : > { %v1302_v43 = vpop.eup %1301  ;;  %v658_v44 = vmul.f32 %v1782_v19, %v632_v39  ;;  %v633_v29 = vadd.f32 %v616_v40, %v303_v26  ;;  %v617_v30 = vsub.f32 1.0, %v1300_v41  ;;  %v309_v41 = vld [vmem:[%s1697_s7 + $0x38] sm:$0xff] }
 0x14e   : > { %v1304_v46 = vpop.eup %1303  ;;  %v666_v47 = vmul.f32 %v1782_v19, %v640_v25  ;;  %v641_v48 = vadd.f32 %v624_v42, %v311_v28  ;;  %v625_v32 = vsub.f32 1.0, %v1302_v43 }
 0x14f   : > { %v1306_v50 = vpop.eup %1305  ;;  %1065 = vmatprep.mubr.f32.mxu0 %v658_v44  ;;  %v659_v51 = vmul.f32 %v1782_v19, %v633_v29  ;;  %v634_v52 = vadd.f32 %v617_v30, %v304_v27  ;;  %v618_v53 = vsub.f32 1.0, %v1304_v46  ;;  %v317_v44 = vld [vmem:[%s1697_s7 + $0x78] sm:$0xff] }
 0x150   : > { %v1308_v33 = vpop.eup %1307  ;;  %1077 = vmatprep.mubr.f32.mxu1 %v666_v47  ;;  %v667_v56 = vmul.f32 %v1782_v19, %v641_v48  ;;  %v642_v57 = vadd.f32 %v625_v32, %v312_v45  ;;  %v626_v58 = vsub.f32 1.0, %v1306_v50  ;;  %v992_v46 = vld [vmem:[%s1891_s3] ss:$0 sm:$0xff] }
 0x151   : > { %v1310_v34 = vpop.eup %1309  ;;  %1066 = vmatmul.mubr.f32.vlgmr.msra.gmra.mxu0 %v659_v51  ;;  %v660_v60 = vmul.f32 %v1782_v19, %v634_v52  ;;  %v635_v31 = vadd.f32 %v618_v53, %v305_v49  ;;  %v619_v55 = vsub.f32 1.0, %v1308_v33 }
 0x152   : > { %v1312_v0 = vpop.eup %1311  ;;  %1078 = vmatmul.mubr.f32.vlgmr.msra.gmra.mxu1 %v667_v56  ;;  %v668_v62 = vmul.f32 %v1782_v19, %v642_v57  ;;  %v643_v63 = vadd.f32 %v626_v58, %v313_v54  ;;  %v627_v1 = vsub.f32 1.0, %v1310_v34 }
 0x153   : > { %v1314_v2 = vpop.eup %1313  ;;  %1068 = vmatprep.mubr.f32.mxu0 %v660_v60  ;;  %v661_v3 = vmul.f32 %v1782_v19, %v635_v31  ;;  %v636_v4 = vadd.f32 %v619_v55, %v306_v59  ;;  %v574_v6 = vadd.f32 1.0, %v1312_v0 }
 0x154   : > { %v1316_v7 = vpop.eup %1315  ;;  %1080 = vmatprep.mubr.f32.mxu1 %v668_v62  ;;  %v669_v8 = vmul.f32 %v1782_v19, %v643_v63  ;;  %v644_v9 = vadd.f32 %v627_v1, %v314_v61  ;;  %v620_v10 = vsub.f32 1.0, %v1314_v2 }
 0x155   : > { %v1318_v12 = vpop.eup %1317  ;;  %1069 = vmatmul.mubr.f32.gmra.mxu0 %v661_v3  ;;  %v662_v14 = vmul.f32 %v1782_v19, %v636_v4  ;;  %v628_v15 = vsub.f32 1.0, %v1316_v7  ;;  %1323 = vrcp.f32 %v574_v6 }
 0x156   : > { %v1320_v16 = vpop.eup %1319  ;;  %1081 = vmatmul.mubr.f32.gmra.mxu1 %v669_v8  ;;  %v670_v17 = vmul.f32 %v1782_v19, %v644_v9  ;;  %v637_v18 = vadd.f32 %v620_v10, %v307_v5  ;;  %v621_v21 = vsub.f32 1.0, %v1318_v12 }
 0x157   : > { %v1322_v22 = vpop.eup %1321  ;;  %1071 = vmatprep.mubr.f32.mxu0 %v662_v14  ;;  %v645_v36 = vadd.f32 %v628_v15, %v315_v11  ;;  %v629_v37 = vsub.f32 1.0, %v1320_v16 }
 0x158   : > { %1083 = vmatprep.mubr.f32.mxu1 %v670_v17  ;;  %v663_v20 = vmul.f32 %v1782_v19, %v637_v18  ;;  %v638_v23 = vadd.f32 %v621_v21, %v308_v13  ;;  %v582_v24 = vadd.f32 1.0, %v1322_v22 }
 0x159   : > { %v671_v26 = vmul.f32 %v1782_v19, %v645_v36  ;;  %v646_v38 = vadd.f32 %v629_v37, %v316_v35 }
 0x15a   : > { %1072 = vmatmul.mubr.f32.gmra.mxu0 %v663_v20  ;;  %v664_v39 = vmul.f32 %v1782_v19, %v638_v23  ;;  %1325 = vrcp.f32 %v582_v24 }
 0x15b   : > { %1084 = vmatmul.mubr.f32.gmra.mxu1 %v671_v26  ;;  %v672_v40 = vmul.f32 %v1782_v19, %v646_v38 }
 0x15c   : > { %1074 = vmatprep.mubr.f32.mxu0 %v664_v39 }
 0x15d   : > { %1086 = vmatprep.mubr.f32.mxu1 %v672_v40 }
 0x162   : > { %v1324_v28 = vpop.eup %1323 }
 0x163   : > { %v622_v25 = vsub.f32 1.0, %v1324_v28 }
 0x165   : > { %v639_v42 = vadd.f32 %v622_v25, %v309_v41 }
 0x167   : > { %v1326_v27 = vpop.eup %1325  ;;  %v665_v43 = vmul.f32 %v1782_v19, %v639_v42 }
 0x168   : > { %v630_v29 = vsub.f32 1.0, %v1326_v27 }
 0x169   : > { %1075 = vmatmul.mubr.f32.gmra.mxu0 %v665_v43 }
 0x16a   : > { %v647_v30 = vadd.f32 %v630_v29, %v317_v44 }
 0x16c   : > { %v673_v45 = vmul.f32 %v1782_v19, %v647_v30 }
 0x16e   : > { %1087 = vmatmul.mubr.f32.gmra.mxu1 %v673_v45 }
 0x211   : > { %v1067_v47 = vpop.f32.mrf.mxu0 }
 0x212   : > { %v769_v48 = vadd.f32 %v1067_v47, %v992_v46  ;;  %v1079_v32 = vpop.f32.mrf.mxu1 }
 0x213   : > { %v809_v49 = vadd.f32 %v1079_v32, %v992_v46  ;;  %v763_v50 = vpop.f32.mrf.mxu0 }
 0x214   : > { %843 = vst [vmem:[%s1820_s19 + $0x8] sm:$0xff] %v769_v48  ;;  %v764_v19 = vadd.f32 %v992_v46, %v763_v50  ;;  %v803_v51 = vpop.f32.mrf.mxu1 }
 0x215   : > { %851 = vst [vmem:[%s1820_s19 + $0x48] sm:$0xff] %v809_v49  ;;  %v804_v52 = vadd.f32 %v992_v46, %v803_v51  ;;  %v1070_v53 = vpop.f32.mrf.mxu0 }
 0x216   : > { %842 = vst [vmem:[%s1820_s19] sm:$0xff] %v764_v19  ;;  %v779_v54 = vadd.f32 %v1070_v53, %v992_v46  ;;  %v1082_v33 = vpop.f32.mrf.mxu1 }
 0x217   : > { %850 = vst [vmem:[%s1820_s19 + $0x40] sm:$0xff] %v804_v52  ;;  %v819_v56 = vadd.f32 %v1082_v33, %v992_v46  ;;  %v773_v57 = vpop.f32.mrf.mxu0 }
 0x218   : > { %845 = vst [vmem:[%s1820_s19 + $0x18] sm:$0xff] %v779_v54  ;;  %v774_v58 = vadd.f32 %v992_v46, %v773_v57  ;;  %v813_v59 = vpop.f32.mrf.mxu1 }
 0x219   : > { %853 = vst [vmem:[%s1820_s19 + $0x58] sm:$0xff] %v819_v56  ;;  %v814_v34 = vadd.f32 %v992_v46, %v813_v59 }
 0x21a   : > { %844 = vst [vmem:[%s1820_s19 + $0x10] sm:$0xff] %v774_v58  ;;  %v1073_v60 = vpop.f32.mrf.mxu0 }
 0x21b   : > { %852 = vst [vmem:[%s1820_s19 + $0x50] sm:$0xff] %v814_v34  ;;  %v789_v31 = vadd.f32 %v1073_v60, %v992_v46  ;;  %v1085_v55 = vpop.f32.mrf.mxu1 }
 0x21c   : > { %v829_v61 = vadd.f32 %v1085_v55, %v992_v46  ;;  %v783_v0 = vpop.f32.mrf.mxu0 }
 0x21d   : > { %847 = vst [vmem:[%s1820_s19 + $0x28] sm:$0xff] %v789_v31  ;;  %v784_v62 = vadd.f32 %v992_v46, %v783_v0  ;;  %v823_v63 = vpop.f32.mrf.mxu1 }
 0x21e   : > { %855 = vst [vmem:[%s1820_s19 + $0x68] sm:$0xff] %v829_v61  ;;  %v824_v1 = vadd.f32 %v992_v46, %v823_v63 }
 0x21f   : > { %846 = vst [vmem:[%s1820_s19 + $0x20] sm:$0xff] %v784_v62 }
 0x220   : > { %854 = vst [vmem:[%s1820_s19 + $0x60] sm:$0xff] %v824_v1 }
 0x229   : > { %v1076_v2 = vpop.f32.mrf.mxu0 }
 0x22a   : > { %v799_v3 = vadd.f32 %v1076_v2, %v992_v46 }
 0x22b   : > { %v793_v4 = vpop.f32.mrf.mxu0 }
 0x22c   : > { %849 = vst [vmem:[%s1820_s19 + $0x38] sm:$0xff] %v799_v3  ;;  %v794_v5 = vadd.f32 %v992_v46, %v793_v4 }
 0x22e   : > { %v1088_v6 = vpop.f32.mrf.mxu1  ;;  %848 = vst [vmem:[%s1820_s19 + $0x30] sm:$0xff] %v794_v5 }
 0x22f   : > { %v839_v7 = vadd.f32 %v1088_v6, %v992_v46 }
 0x230   : > { %v833_v8 = vpop.f32.mrf.mxu1 }
 0x231   : > { %857 = vst [vmem:[%s1820_s19 + $0x78] sm:$0xff] %v839_v7  ;;  %v834_v9 = vadd.f32 %v992_v46, %v833_v8 }
 0x233   : > { %856 = vst [vmem:[%s1820_s19 + $0x70] sm:$0xff] %v834_v9 }
 0x234   : > { %1422 = shalt.err (!%p1419_p10)
}
 0x235   : > { %s1423_s13 = scalar_lea.hbm %s1841_s8, 2048  ;;  %s1427_s7 = scalar_lea.hbm %s1893_s5, 4096 }
 0x236   : > { %p1424_p1 = scmp.ne.s32.totalorder %s1841_s8, %s1423_s13  ;;  %p1428_p7 = scmp.lt.s32.totalorder %s1841_s8, %s1893_s5 }
 0x237   : > { %p1429_p8 = scmp.lt.s32.totalorder %s1427_s7, %s1423_s13 }
 0x238   : > { %p1425_p4 = pnand %p1424_p1, %p1918_p9 }
 0x239   : > { %p1430_p11 = por %p1429_p8, %p1428_p7 }
 0x23a   : > { %p1426_p3 = pneg %p1425_p4 }
 0x23c   : > { %p1431_p6 = pnand %p1430_p11, %p1426_p3 }
 0x23e   : > { %1434 = shalt.err (!%p1431_p6)
}
 0x23f   : > { %s1490_s2 = smov 128   ;;  %s1491_s25 = smov 8  }
 0x240   : > { %1129 = dma.vmem_to_hbm [thread:$0]  (%p1918_p9), %s1843_s29, 2048, %s1841_s8, %s859_s9, %s1490_s2, %s1490_s2, %s1491_s25  }
 0x241 PF: > { %s887_s10 = sand.u32 1, %s1469_s20   ;;  %p1919_p12 = scmp.ne.s32.totalorder %s1904_s26, 0 }
 0x242   : > { %p1920_p13 = scmp.ge.s32.totalorder %s1481_s23, 2  ;;  %s888_s19 = scalar_lea.sflag [#allocation5], %s887_s10 }
 0x244   : > { %p1143_p0 = pnand %p1920_p13, %p1919_p12 }
 0x246   : > { %p1144_p5 = pneg %p1143_p0 }
 0x248   : > { %1464 = dma.done.wait (%p1144_p5), %s888_s19, 2048  }
 0x249   : > { %1466 = vsyncadd (%p1144_p5), %s888_s19, 4294965248  ;;  %s1921_s24 = sld [smem:[#allocation14_spill]]  ;;  %p23_p2 = scmp.ge.s32.totalorder %s1579_s6, 4  }
 0x24a   : > { %s1922_s20 = smov %s1473_s21  ;;  %s1923_s21 = smov %s1477_s22 }
 0x24b   : > { %s1925_s23 = smov %s1579_s6  ;;  %25 = sbr.rel (!%p23_p2) target bundleno = 10 (0xa), region = 102 }
 0x24f   : > { %s1924_s22 = smov %s1921_s24 }
 0x250   :  { %893 = vsyncpa [#allocation4], 1 }
 0x251   :  { %895 = vsyncpa [#allocation4 + $0x1], 1 }
 0x252   :  { %896 = vsyncpa [#allocation7], 1 }
 0x253   :  { %898 = vsyncpa [#allocation7 + $0x1], 1 }
 0x254   :  { %899 = vsyncpa [#allocation5], 1 }
 0x255   :  { %901 = vsyncpa [#allocation5 + $0x1], 1 }

</bundles_post_ra>
